<compile_context>
chip_gen: v7x
topology: tpu7x:2x2x1
jax: 0.10.0
libtpu: 0.0.40
codegen_flags: <defaults>
</compile_context>

<pallas_src>
import functools

import jax
import jax.numpy as jnp
import numpy as np
from jax.experimental import pallas as pl
from jax.experimental.pallas import tpu as pltpu


def _mask_kernel(x_ref, w_ref, b_ref, o_ref, *, ic, icp, inner_b, unroll):
    # x_ref : (Bb, T, IC)      unpadded input block
    # w_ref : (IC, 2*ICp)      fused [W1.T | W2.T], N-halves zero-padded to ICp
    # b_ref : (1, 2*ICp)       fused [b1 | b2], zero-padded
    # o_ref : (Bb, T, IC)      unpadded output block
    bb, t, _ = x_ref.shape
    n_chunks = bb // inner_b
    m = inner_b * t

    # (1, ICp) lane masks for the pool boundaries; jnp.where broadcasts them.
    col = jax.lax.broadcasted_iota(jnp.int32, (1, icp), 1)
    first = col == 0
    last = col == ic - 1
    neg_inf = jnp.float32(-jnp.inf)
    third = jnp.float32(1.0 / 3.0)
    eps = jnp.float32(1e-8)

    def chunk(i):
        start = i * inner_b
        if not isinstance(start, int):
            start = pl.multiple_of(start, inner_b)
        xs = x_ref[pl.ds(start, inner_b)]                     # (inner_b, T, IC)
        xm = xs.reshape(m, ic)                                # fold B*T into MXU M dim

        # ---- fused linear layers: one MXU matmul, split at the 128-aligned seam
        y = jnp.dot(xm, w_ref[...],
                    preferred_element_type=jnp.float32) + b_ref[...]
        y1 = y[:, :icp]                                       # linear1 (padded lanes == 0)
        y2 = y[:, icp:]                                       # linear2 (padded lanes == 0)

        # ---- AvgPool1d(kernel=3, stride=1, pad=1), count_include_pad=True (zero pad)
        y1_prev = jnp.where(first, 0.0, pltpu.roll(y1, shift=1, axis=1))
        y1_next = jnp.where(last, 0.0, pltpu.roll(y1, shift=icp - 1, axis=1))
        ap = (y1_prev + y1 + y1_next) * third

        # ---- MaxPool1d(kernel=3, stride=1, pad=1)  (implicit -inf padding)
        y2_prev = jnp.where(first, neg_inf, pltpu.roll(y2, shift=1, axis=1))
        y2_next = jnp.where(last, neg_inf, pltpu.roll(y2, shift=icp - 1, axis=1))
        mp = jnp.maximum(jnp.maximum(y2_prev, y2), y2_next)

        # ---- cosine similarity along T (dim=1), PyTorch-style per-norm eps clamp
        ap3 = ap.reshape(inner_b, t, icp)
        mp3 = mp.reshape(inner_b, t, icp)
        w12 = jnp.sum(ap3 * mp3, axis=1)                      # (inner_b, ICp)
        n1 = jnp.maximum(jnp.sqrt(jnp.sum(ap3 * ap3, axis=1)), eps)
        n2 = jnp.maximum(jnp.sqrt(jnp.sum(mp3 * mp3, axis=1)), eps)
        csim = w12 * pl.reciprocal(n1 * n2, approx=False)     # divide -> EUP slot
        csim = csim if icp == ic else csim[:, :ic]            # drop padded lanes

        # Re-index x_ref at the store to keep its live range short.
        o_ref[pl.ds(start, inner_b)] = (
            csim[:, None, :] * x_ref[pl.ds(start, inner_b)]
        ).astype(o_ref.dtype)

    if n_chunks == 1:
        chunk(0)
    else:
        def body(i, carry):
            chunk(i)
            return carry
        jax.lax.fori_loop(0, n_chunks, body, 0, unroll=unroll)


def _round_up(v, m):
    return (v + m - 1) // m * m


def _vmem_budgets():
    """Generation-aware VMEM budgets (v5e/v6e: 128 MiB, v7x: 64 MiB per TC)."""
    phys = 64 * 1024 * 1024  # conservative default = v7x per-TC VMEM
    try:
        phys = int(pltpu.get_tpu_info().vmem_capacity_bytes)
    except Exception:
        pass
    tile_budget = int(phys * 0.40)   # blocks + weights; headroom for temps
    vmem_limit = int(phys * 0.75)    # scoped VMEM limit handed to Mosaic
    return tile_budget, vmem_limit


def _pick_block_b(b, t, ic, tile_budget_bytes, reserved_bytes, max_block):
    """Largest divisor of B (<= max_block) whose double-buffered in+out blocks
    plus the (conservatively double-buffered) weight fit the VMEM budget."""
    best = 1
    for bb in range(1, max_block + 1):
        if b % bb:
            continue
        io_bytes = 4 * (bb * t * ic * 4)  # 2x input + 2x output block, f32
        if io_bytes + reserved_bytes <= tile_budget_bytes:
            best = bb
    return best


def _pick_inner_b(block_b, t, target_rows=256):
    """Largest divisor of block_b whose row chunk stays near the register file."""
    best = 1
    for ib in range(1, block_b + 1):
        if block_b % ib == 0 and ib * t <= max(target_rows, t):
            best = ib
    return best


def mask_forward(x, w1, b1, w2, b2, block_b=None):
    """x: (B, T, IC) f32; w1/w2: (IC, IC) PyTorch layout (out, in); b1/b2: (IC,)."""
    B, T, IC = x.shape
    ICp = _round_up(IC, 128)
    pad_n = ICp - IC

    # Fused, transposed weights; only the output (N) halves are padded to 128 so
    # the y1/y2 seam is lane-aligned.  K dim stays at IC (x is NOT padded).
    w_f = jnp.concatenate(
        [jnp.pad(w1.T.astype(jnp.float32), ((0, 0), (0, pad_n))),
         jnp.pad(w2.T.astype(jnp.float32), ((0, 0), (0, pad_n)))], axis=1)
    b_f = jnp.concatenate(
        [jnp.pad(b1.astype(jnp.float32), (0, pad_n)),
         jnp.pad(b2.astype(jnp.float32), (0, pad_n))]).reshape(1, 2 * ICp)

    tile_budget, vmem_limit = _vmem_budgets()
    # Conservatively assume double-buffered weight + bias when budgeting.
    reserved_bytes = 2 * (IC * 2 * ICp * 4) + 2 * (2 * ICp * 4)
    # TODO(synk): for very large IC the fused f32 weight can exceed VMEM; add a
    # K-tiled grid axis ("arbitrary") with a VMEM accumulator for that regime.

    if block_b is None:
        # Guarantee a multi-step grid so the DMA pipeline overlaps and both
        # v7x TensorCores get work.
        max_block = B // 4 if B >= 4 else (B // 2 if B >= 2 else 1)
        max_block = max(1, max_block)
        block_b = _pick_block_b(B, T, IC, tile_budget, reserved_bytes, max_block)
    grid = (B // block_b,)
    inner_b = _pick_inner_b(block_b, T)
    n_chunks = block_b // inner_b

    kernel = functools.partial(_mask_kernel, ic=IC, icp=ICp,
                               inner_b=inner_b, unroll=(n_chunks <= 8))

    def run(single_buffer_invariants):
        inv_kw = ({"pipeline_mode": pl.Buffered(1)}
                  if single_buffer_invariants else {})
        return pl.pallas_call(
            kernel,
            out_shape=jax.ShapeDtypeStruct((B, T, IC), x.dtype),
            grid=grid,
            in_specs=[
                pl.BlockSpec((block_b, T, IC), lambda b: (b, 0, 0)),
                pl.BlockSpec((IC, 2 * ICp), lambda b: (0, 0), **inv_kw),
                pl.BlockSpec((1, 2 * ICp), lambda b: (0, 0), **inv_kw),
            ],
            out_specs=pl.BlockSpec((block_b, T, IC), lambda b: (b, 0, 0)),
            compiler_params=pltpu.CompilerParams(
                dimension_semantics=("parallel",),   # megacore on v7x
                vmem_limit_bytes=vmem_limit,
            ),
        )(x, w_f, b_f)

    try:
        # Grid-invariant weight/bias single-buffered to halve their VMEM cost.
        return run(True)
    except Exception:
        # Fallback if this jax build rejects Buffered(1) on pallas_call specs.
        return run(False)


def mask_reference(x, w1, b1, w2, b2):
    """Pure-JAX reference mirroring the PyTorch forward."""
    y1 = jnp.einsum("btl,kl->btk", x, w1) + b1
    y2 = jnp.einsum("btl,kl->btk", x, w2) + b2
    p1 = jnp.pad(y1, ((0, 0), (0, 0), (1, 1)))
    ap = (p1[..., :-2] + p1[..., 1:-1] + p1[..., 2:]) * (1.0 / 3.0)
    p2 = jnp.pad(y2, ((0, 0), (0, 0), (1, 1)), constant_values=-jnp.inf)
    mp = jnp.maximum(jnp.maximum(p2[..., :-2], p2[..., 1:-1]), p2[..., 2:])
    w12 = jnp.sum(ap * mp, axis=1)
    n1 = jnp.maximum(jnp.sqrt(jnp.sum(ap * ap, axis=1)), 1e-8)
    n2 = jnp.maximum(jnp.sqrt(jnp.sum(mp * mp, axis=1)), 1e-8)
    csim = w12 / (n1 * n2)
    return csim[:, None, :] * x


if __name__ == "__main__":
    B, T, IC = 2, 8, 32                    # batch, tp, ic (small, consistent with module)

    key = jax.random.PRNGKey(0)
    kx, kw1, kb1, kw2, kb2 = jax.random.split(key, 5)
    bound = 1.0 / np.sqrt(IC)              # PyTorch nn.Linear default init range
    x = jax.random.normal(kx, (B, T, IC), dtype=jnp.float32)
    w1 = jax.random.uniform(kw1, (IC, IC), jnp.float32, -bound, bound)
    b1 = jax.random.uniform(kb1, (IC,), jnp.float32, -bound, bound)
    w2 = jax.random.uniform(kw2, (IC, IC), jnp.float32, -bound, bound)
    b2 = jax.random.uniform(kb2, (IC,), jnp.float32, -bound, bound)

    out = jax.block_until_ready(mask_forward(x, w1, b1, w2, b2))
    ref = jax.block_until_ready(mask_reference(x, w1, b1, w2, b2))

    np.testing.assert_allclose(np.asarray(out), np.asarray(ref),
                               rtol=1e-5, atol=1e-5)
    print("KERNEL_OK")
</pallas_src>

<mosaic_0001>
module attributes {stable_mosaic.version = 11 : i64} {
  func.func @_mask_kernel(%arg0: i32, %arg1: memref<1x8x32xf32, #tpu.memory_space<vmem>>, %arg2: memref<32x256xf32, #tpu.memory_space<vmem>>, %arg3: memref<1x256xf32, #tpu.memory_space<vmem>>, %arg4: memref<1x8x32xf32, #tpu.memory_space<vmem>>) attributes {dimension_semantics = [#tpu.dimension_semantics<parallel>], iteration_bounds = array<i64: 2>, scalar_prefetch = 0 : i64, scratch_operands = 0 : i64, tpu.core_type = #tpu.core_type<tc>, window_params = [{transform_indices = @transform_0, window_bounds = array<i64: 1, 8, 32>}, {pipeline_mode = #tpu.pipeline_mode<synchronous>, transform_indices = @transform_1, window_bounds = array<i64: 32, 256>}, {pipeline_mode = #tpu.pipeline_mode<synchronous>, transform_indices = @transform_2, window_bounds = array<i64: 1, 256>}, {transform_indices = @transform_3, window_bounds = array<i64: 1, 8, 32>}]} {
    %0 = tpu.iota {dimensions = array<i32: 1>} : vector<1x128xi32>
    %c0_i32 = arith.constant 0 : i32
    %1 = vector.broadcast %c0_i32 : i32 to vector<1x128xi32>
    %2 = arith.cmpi eq, %0, %1 : vector<1x128xi32>
    %c31_i32 = arith.constant 31 : i32
    %3 = vector.broadcast %c31_i32 : i32 to vector<1x128xi32>
    %4 = arith.cmpi eq, %0, %3 : vector<1x128xi32>
    %c0 = arith.constant 0 : index
    %c0_0 = arith.constant 0 : index
    %c0_1 = arith.constant 0 : index
    %5 = vector.load %arg1[%c0, %c0_0, %c0_1] : memref<1x8x32xf32, #tpu.memory_space<vmem>>, vector<1x8x32xf32>
    %6 = vector.shape_cast %5 : vector<1x8x32xf32> to vector<8x32xf32>
    %c0_2 = arith.constant 0 : index
    %c0_3 = arith.constant 0 : index
    %7 = vector.load %arg2[%c0_2, %c0_3] : memref<32x256xf32, #tpu.memory_space<vmem>>, vector<32x256xf32>
    %cst = arith.constant dense<0.000000e+00> : vector<8x256xf32>
    %8 = tpu.matmul %6, %7, %cst {dimension_numbers = #tpu.dot_dimension_numbers<[1], [0], [0], [1], [0, 0, 1, 1], [], []>} : vector<8x32xf32>, vector<32x256xf32>, vector<8x256xf32> -> vector<8x256xf32>
    %c0_4 = arith.constant 0 : index
    %c0_5 = arith.constant 0 : index
    %9 = vector.load %arg3[%c0_4, %c0_5] : memref<1x256xf32, #tpu.memory_space<vmem>>, vector<1x256xf32>
    %10 = vector.broadcast %9 : vector<1x256xf32> to vector<8x256xf32>
    %11 = arith.addf %8, %10 : vector<8x256xf32>
    %12 = vector.extract_strided_slice %11 {offsets = [0, 0], sizes = [8, 128], strides = [1, 1]} : vector<8x256xf32> to vector<8x128xf32>
    %13 = vector.extract_strided_slice %11 {offsets = [0, 128], sizes = [8, 128], strides = [1, 1]} : vector<8x256xf32> to vector<8x128xf32>
    %c1_i32 = arith.constant 1 : i32
    %14 = tpu.dynamic_rotate %12 by %c1_i32 dim 1 : vector<8x128xf32>, i32 -> vector<8x128xf32>
    %cst_6 = arith.constant 0.000000e+00 : f32
    %15 = vector.shape_cast %2 : vector<1x128xi1> to vector<1x128xi1>
    %16 = vector.broadcast %15 : vector<1x128xi1> to vector<8x128xi1>
    %17 = vector.broadcast %cst_6 : f32 to vector<8x128xf32>
    %18 = arith.select %16, %17, %14 : vector<8x128xi1>, vector<8x128xf32>
    %c127_i32 = arith.constant 127 : i32
    %19 = tpu.dynamic_rotate %12 by %c127_i32 dim 1 : vector<8x128xf32>, i32 -> vector<8x128xf32>
    %cst_7 = arith.constant 0.000000e+00 : f32
    %20 = vector.shape_cast %4 : vector<1x128xi1> to vector<1x128xi1>
    %21 = vector.broadcast %20 : vector<1x128xi1> to vector<8x128xi1>
    %22 = vector.broadcast %cst_7 : f32 to vector<8x128xf32>
    %23 = arith.select %21, %22, %19 : vector<8x128xi1>, vector<8x128xf32>
    %24 = arith.addf %18, %12 : vector<8x128xf32>
    %25 = arith.addf %24, %23 : vector<8x128xf32>
    %cst_8 = arith.constant 0.333333343 : f32
    %26 = vector.broadcast %cst_8 : f32 to vector<8x128xf32>
    %27 = arith.mulf %25, %26 : vector<8x128xf32>
    %c1_i32_9 = arith.constant 1 : i32
    %28 = tpu.dynamic_rotate %13 by %c1_i32_9 dim 1 : vector<8x128xf32>, i32 -> vector<8x128xf32>
    %cst_10 = arith.constant 0xFF800000 : f32
    %29 = vector.shape_cast %2 : vector<1x128xi1> to vector<1x128xi1>
    %30 = vector.broadcast %29 : vector<1x128xi1> to vector<8x128xi1>
    %31 = vector.broadcast %cst_10 : f32 to vector<8x128xf32>
    %32 = arith.select %30, %31, %28 : vector<8x128xi1>, vector<8x128xf32>
    %c127_i32_11 = arith.constant 127 : i32
    %33 = tpu.dynamic_rotate %13 by %c127_i32_11 dim 1 : vector<8x128xf32>, i32 -> vector<8x128xf32>
    %cst_12 = arith.constant 0xFF800000 : f32
    %34 = vector.shape_cast %4 : vector<1x128xi1> to vector<1x128xi1>
    %35 = vector.broadcast %34 : vector<1x128xi1> to vector<8x128xi1>
    %36 = vector.broadcast %cst_12 : f32 to vector<8x128xf32>
    %37 = arith.select %35, %36, %33 : vector<8x128xi1>, vector<8x128xf32>
    %38 = arith.maximumf %32, %13 : vector<8x128xf32>
    %39 = arith.maximumf %38, %37 : vector<8x128xf32>
    %40 = vector.shape_cast %27 : vector<8x128xf32> to vector<1x8x128xf32>
    %41 = vector.shape_cast %39 : vector<8x128xf32> to vector<1x8x128xf32>
    %42 = arith.mulf %40, %41 : vector<1x8x128xf32>
    %cst_13 = arith.constant dense<0.000000e+00> : vector<1x128xf32>
    %43 = vector.multi_reduction <add>, %42, %cst_13 [1] : vector<1x8x128xf32> to vector<1x128xf32>
    %44 = arith.mulf %40, %40 : vector<1x8x128xf32>
    %cst_14 = arith.constant dense<0.000000e+00> : vector<1x128xf32>
    %45 = vector.multi_reduction <add>, %44, %cst_14 [1] : vector<1x8x128xf32> to vector<1x128xf32>
    %46 = math.sqrt %45 : vector<1x128xf32>
    %cst_15 = arith.constant 9.99999993E-9 : f32
    %47 = vector.broadcast %cst_15 : f32 to vector<1x128xf32>
    %48 = arith.maximumf %46, %47 : vector<1x128xf32>
    %49 = arith.mulf %41, %41 : vector<1x8x128xf32>
    %cst_16 = arith.constant dense<0.000000e+00> : vector<1x128xf32>
    %50 = vector.multi_reduction <add>, %49, %cst_16 [1] : vector<1x8x128xf32> to vector<1x128xf32>
    %51 = math.sqrt %50 : vector<1x128xf32>
    %cst_17 = arith.constant 9.99999993E-9 : f32
    %52 = vector.broadcast %cst_17 : f32 to vector<1x128xf32>
    %53 = arith.maximumf %51, %52 : vector<1x128xf32>
    %54 = arith.mulf %48, %53 : vector<1x128xf32>
    %55 = tpu.reciprocal %54 : vector<1x128xf32> -> vector<1x128xf32>
    %56 = arith.mulf %43, %55 : vector<1x128xf32>
    %57 = vector.extract_strided_slice %56 {offsets = [0, 0], sizes = [1, 32], strides = [1, 1]} : vector<1x128xf32> to vector<1x32xf32>
    %58 = vector.shape_cast %57 : vector<1x32xf32> to vector<1x1x32xf32>
    %c0_18 = arith.constant 0 : index
    %c0_19 = arith.constant 0 : index
    %c0_20 = arith.constant 0 : index
    %59 = vector.load %arg1[%c0_18, %c0_19, %c0_20] : memref<1x8x32xf32, #tpu.memory_space<vmem>>, vector<1x8x32xf32>
    %60 = vector.broadcast %58 : vector<1x1x32xf32> to vector<1x8x32xf32>
    %61 = arith.mulf %60, %59 : vector<1x8x32xf32>
    %c0_21 = arith.constant 0 : index
    %c0_22 = arith.constant 0 : index
    %c0_23 = arith.constant 0 : index
    %62 = vector.load %arg4[%c0_21, %c0_22, %c0_23] : memref<1x8x32xf32, #tpu.memory_space<vmem>>, vector<1x8x32xf32>
    tpu.vector_store %arg4[%c0_21, %c0_22, %c0_23], %61 {strides = array<i32>} : memref<1x8x32xf32, #tpu.memory_space<vmem>>, vector<1x8x32xf32>,
    return
  }
  func.func @transform_0(%arg0: i32) -> (i32, i32, i32) {
    %c0_i32 = arith.constant 0 : i32
    %c0_i32_0 = arith.constant 0 : i32
    %c0_i32_1 = arith.constant 0 : i32
    return %arg0, %c0_i32, %c0_i32_0 : i32, i32, i32
  }
  func.func @transform_1(%arg0: i32) -> (i32, i32) {
    %c0_i32 = arith.constant 0 : i32
    %c0_i32_0 = arith.constant 0 : i32
    %c0_i32_1 = arith.constant 0 : i32
    return %c0_i32, %c0_i32_0 : i32, i32
  }
  func.func @transform_2(%arg0: i32) -> (i32, i32) {
    %c0_i32 = arith.constant 0 : i32
    %c0_i32_0 = arith.constant 0 : i32
    %c0_i32_1 = arith.constant 0 : i32
    return %c0_i32, %c0_i32_0 : i32, i32
  }
  func.func @transform_3(%arg0: i32) -> (i32, i32, i32) {
    %c0_i32 = arith.constant 0 : i32
    %c0_i32_0 = arith.constant 0 : i32
    %c0_i32_1 = arith.constant 0 : i32
    return %arg0, %c0_i32, %c0_i32_0 : i32, i32, i32
  }
}

module attributes {stable_mosaic.version = 11 : i64} {
  func.func @_mask_kernel(%arg0: i32, %arg1: memref<1x8x32xf32, #tpu.memory_space<vmem>>, %arg2: memref<32x256xf32, #tpu.memory_space<vmem>>, %arg3: memref<1x256xf32, #tpu.memory_space<vmem>>, %arg4: memref<1x8x32xf32, #tpu.memory_space<vmem>>) attributes {dimension_semantics = [#tpu.dimension_semantics<parallel>], iteration_bounds = array<i64: 2>, scalar_prefetch = 0 : i64, scratch_operands = 0 : i64, tpu.core_type = #tpu.core_type<tc>, window_params = [{transform_indices = @transform_0, window_bounds = array<i64: 1, 8, 32>}, {pipeline_mode = #tpu.pipeline_mode<synchronous>, transform_indices = @transform_1, window_bounds = array<i64: 32, 256>}, {pipeline_mode = #tpu.pipeline_mode<synchronous>, transform_indices = @transform_2, window_bounds = array<i64: 1, 256>}, {transform_indices = @transform_3, window_bounds = array<i64: 1, 8, 32>}]} {
    %0 = tpu.iota {dimensions = array<i32: 1>} : vector<1x128xi32>
    %c0_i32 = arith.constant 0 : i32
    %1 = vector.broadcast %c0_i32 : i32 to vector<1x128xi32>
    %2 = arith.cmpi eq, %0, %1 : vector<1x128xi32>
    %c31_i32 = arith.constant 31 : i32
    %3 = vector.broadcast %c31_i32 : i32 to vector<1x128xi32>
    %4 = arith.cmpi eq, %0, %3 : vector<1x128xi32>
    %c0 = arith.constant 0 : index
    %c0_0 = arith.constant 0 : index
    %c0_1 = arith.constant 0 : index
    %5 = vector.load %arg1[%c0, %c0_0, %c0_1] : memref<1x8x32xf32, #tpu.memory_space<vmem>>, vector<1x8x32xf32>
    %6 = vector.shape_cast %5 : vector<1x8x32xf32> to vector<8x32xf32>
    %c0_2 = arith.constant 0 : index
    %c0_3 = arith.constant 0 : index
    %7 = vector.load %arg2[%c0_2, %c0_3] : memref<32x256xf32, #tpu.memory_space<vmem>>, vector<32x256xf32>
    %cst = arith.constant dense<0.000000e+00> : vector<8x256xf32>
    %8 = tpu.matmul %6, %7, %cst {dimension_numbers = #tpu.dot_dimension_numbers<[1], [0], [0], [1], [0, 0, 1, 1], [], []>} : vector<8x32xf32>, vector<32x256xf32>, vector<8x256xf32> -> vector<8x256xf32>
    %c0_4 = arith.constant 0 : index
    %c0_5 = arith.constant 0 : index
    %9 = vector.load %arg3[%c0_4, %c0_5] : memref<1x256xf32, #tpu.memory_space<vmem>>, vector<1x256xf32>
    %10 = vector.broadcast %9 : vector<1x256xf32> to vector<8x256xf32>
    %11 = arith.addf %8, %10 : vector<8x256xf32>
    %12 = vector.extract_strided_slice %11 {offsets = [0, 0], sizes = [8, 128], strides = [1, 1]} : vector<8x256xf32> to vector<8x128xf32>
    %13 = vector.extract_strided_slice %11 {offsets = [0, 128], sizes = [8, 128], strides = [1, 1]} : vector<8x256xf32> to vector<8x128xf32>
    %c1_i32 = arith.constant 1 : i32
    %14 = tpu.dynamic_rotate %12 by %c1_i32 dim 1 : vector<8x128xf32>, i32 -> vector<8x128xf32>
    %cst_6 = arith.constant 0.000000e+00 : f32
    %15 = vector.shape_cast %2 : vector<1x128xi1> to vector<1x128xi1>
    %16 = vector.broadcast %15 : vector<1x128xi1> to vector<8x128xi1>
    %17 = vector.broadcast %cst_6 : f32 to vector<8x128xf32>
    %18 = arith.select %16, %17, %14 : vector<8x128xi1>, vector<8x128xf32>
    %c127_i32 = arith.constant 127 : i32
    %19 = tpu.dynamic_rotate %12 by %c127_i32 dim 1 : vector<8x128xf32>, i32 -> vector<8x128xf32>
    %cst_7 = arith.constant 0.000000e+00 : f32
    %20 = vector.shape_cast %4 : vector<1x128xi1> to vector<1x128xi1>
    %21 = vector.broadcast %20 : vector<1x128xi1> to vector<8x128xi1>
    %22 = vector.broadcast %cst_7 : f32 to vector<8x128xf32>
    %23 = arith.select %21, %22, %19 : vector<8x128xi1>, vector<8x128xf32>
    %24 = arith.addf %18, %12 : vector<8x128xf32>
    %25 = arith.addf %24, %23 : vector<8x128xf32>
    %cst_8 = arith.constant 0.333333343 : f32
    %26 = vector.broadcast %cst_8 : f32 to vector<8x128xf32>
    %27 = arith.mulf %25, %26 : vector<8x128xf32>
    %c1_i32_9 = arith.constant 1 : i32
    %28 = tpu.dynamic_rotate %13 by %c1_i32_9 dim 1 : vector<8x128xf32>, i32 -> vector<8x128xf32>
    %cst_10 = arith.constant 0xFF800000 : f32
    %29 = vector.shape_cast %2 : vector<1x128xi1> to vector<1x128xi1>
    %30 = vector.broadcast %29 : vector<1x128xi1> to vector<8x128xi1>
    %31 = vector.broadcast %cst_10 : f32 to vector<8x128xf32>
    %32 = arith.select %30, %31, %28 : vector<8x128xi1>, vector<8x128xf32>
    %c127_i32_11 = arith.constant 127 : i32
    %33 = tpu.dynamic_rotate %13 by %c127_i32_11 dim 1 : vector<8x128xf32>, i32 -> vector<8x128xf32>
    %cst_12 = arith.constant 0xFF800000 : f32
    %34 = vector.shape_cast %4 : vector<1x128xi1> to vector<1x128xi1>
    %35 = vector.broadcast %34 : vector<1x128xi1> to vector<8x128xi1>
    %36 = vector.broadcast %cst_12 : f32 to vector<8x128xf32>
    %37 = arith.select %35, %36, %33 : vector<8x128xi1>, vector<8x128xf32>
    %38 = arith.maximumf %32, %13 : vector<8x128xf32>
    %39 = arith.maximumf %38, %37 : vector<8x128xf32>
    %40 = vector.shape_cast %27 : vector<8x128xf32> to vector<1x8x128xf32>
    %41 = vector.shape_cast %39 : vector<8x128xf32> to vector<1x8x128xf32>
    %42 = arith.mulf %40, %41 : vector<1x8x128xf32>
    %cst_13 = arith.constant dense<0.000000e+00> : vector<1x128xf32>
    %43 = vector.multi_reduction <add>, %42, %cst_13 [1] : vector<1x8x128xf32> to vector<1x128xf32>
    %44 = arith.mulf %40, %40 : vector<1x8x128xf32>
    %cst_14 = arith.constant dense<0.000000e+00> : vector<1x128xf32>
    %45 = vector.multi_reduction <add>, %44, %cst_14 [1] : vector<1x8x128xf32> to vector<1x128xf32>
    %46 = math.sqrt %45 : vector<1x128xf32>
    %cst_15 = arith.constant 9.99999993E-9 : f32
    %47 = vector.broadcast %cst_15 : f32 to vector<1x128xf32>
    %48 = arith.maximumf %46, %47 : vector<1x128xf32>
    %49 = arith.mulf %41, %41 : vector<1x8x128xf32>
    %cst_16 = arith.constant dense<0.000000e+00> : vector<1x128xf32>
    %50 = vector.multi_reduction <add>, %49, %cst_16 [1] : vector<1x8x128xf32> to vector<1x128xf32>
    %51 = math.sqrt %50 : vector<1x128xf32>
    %cst_17 = arith.constant 9.99999993E-9 : f32
    %52 = vector.broadcast %cst_17 : f32 to vector<1x128xf32>
    %53 = arith.maximumf %51, %52 : vector<1x128xf32>
    %54 = arith.mulf %48, %53 : vector<1x128xf32>
    %55 = tpu.reciprocal %54 : vector<1x128xf32> -> vector<1x128xf32>
    %56 = arith.mulf %43, %55 : vector<1x128xf32>
    %57 = vector.extract_strided_slice %56 {offsets = [0, 0], sizes = [1, 32], strides = [1, 1]} : vector<1x128xf32> to vector<1x32xf32>
    %58 = vector.shape_cast %57 : vector<1x32xf32> to vector<1x1x32xf32>
    %c0_18 = arith.constant 0 : index
    %c0_19 = arith.constant 0 : index
    %c0_20 = arith.constant 0 : index
    %59 = vector.load %arg1[%c0_18, %c0_19, %c0_20] : memref<1x8x32xf32, #tpu.memory_space<vmem>>, vector<1x8x32xf32>
    %60 = vector.broadcast %58 : vector<1x1x32xf32> to vector<1x8x32xf32>
    %61 = arith.mulf %60, %59 : vector<1x8x32xf32>
    %c0_21 = arith.constant 0 : index
    %c0_22 = arith.constant 0 : index
    %c0_23 = arith.constant 0 : index
    %62 = vector.load %arg4[%c0_21, %c0_22, %c0_23] : memref<1x8x32xf32, #tpu.memory_space<vmem>>, vector<1x8x32xf32>
    tpu.vector_store %arg4[%c0_21, %c0_22, %c0_23], %61 {strides = array<i32>} : memref<1x8x32xf32, #tpu.memory_space<vmem>>, vector<1x8x32xf32>,
    return
  }
  func.func @transform_0(%arg0: i32) -> (i32, i32, i32) {
    %c0_i32 = arith.constant 0 : i32
    %c0_i32_0 = arith.constant 0 : i32
    %c0_i32_1 = arith.constant 0 : i32
    return %arg0, %c0_i32, %c0_i32_0 : i32, i32, i32
  }
  func.func @transform_1(%arg0: i32) -> (i32, i32) {
    %c0_i32 = arith.constant 0 : i32
    %c0_i32_0 = arith.constant 0 : i32
    %c0_i32_1 = arith.constant 0 : i32
    return %c0_i32, %c0_i32_0 : i32, i32
  }
  func.func @transform_2(%arg0: i32) -> (i32, i32) {
    %c0_i32 = arith.constant 0 : i32
    %c0_i32_0 = arith.constant 0 : i32
    %c0_i32_1 = arith.constant 0 : i32
    return %c0_i32, %c0_i32_0 : i32, i32
  }
  func.func @transform_3(%arg0: i32) -> (i32, i32, i32) {
    %c0_i32 = arith.constant 0 : i32
    %c0_i32_0 = arith.constant 0 : i32
    %c0_i32_1 = arith.constant 0 : i32
    return %arg0, %c0_i32, %c0_i32_0 : i32, i32, i32
  }
}

</mosaic_0001>

<bundles_post_ra>
// kernel: tpu_custom_call.1
= control target key start
LH: loop header
LB: loop body
LE: loop exit
PB: predicated region body
PF: predicated region fallthrough
CT: control target
= control target key end

     0   :  { %8 = vsyncpa [#allocation3], 0  ;;  %s916_s0 = inlined_call_operand.hbm [shape: f32[2,8,32], index: 0, kind: input, shape index: {}]   ;;  %s917_s1 = inlined_call_operand.hbm [shape: f32[32,256], index: 1, kind: input, shape index: {}]   ;;  %s918_s2 = inlined_call_operand.vmem [shape: f32[1,256], index: 2, kind: input, shape index: {}]   ;;  %s919_s3 = inlined_call_operand.hbm [shape: f32[2,8,32], index: 3, kind: output, shape index: {}]  }
   0x1   :  { %10 = vsyncpa [#allocation3 + $0x1], 0 }
   0x2   :  { %11 = vsyncpa [#allocation6], 0 }
   0x3   :  { %12 = vsyncpa [#allocation4], 0 }
   0x4   :  { %14 = vsyncpa [#allocation4 + $0x1], 0  ;;  %s707_s12 = smov 0   ;;  %s709_s13 = smov 0  }
   0x5   :  { %s711_s14 = smov 0   ;;  %s713_s15 = smov 0  }
   0x6 LB: > { %s728_s16 = sadd.s32 4294967295, %s677_s15   ;;  %s458_s17 = sadd.s32 4294967294, %s677_s15   ;;  %s677_s15 = sphi %s713_s15, %s939_s15   ;;  %s673_s14 = sphi %s711_s14, %s938_s14   ;;  %s669_s13 = sphi %s709_s13, %s937_s13   ;;  %s665_s12 = sphi %s707_s12, %s936_s12  }
   0x7   : > { %p40_p0 = scmp.ne.s32.totalorder %s669_s13, %s665_s12  ;;  %p920_p1 = scmp.eq.s32.totalorder %s728_s16, 0 }
   0x8   : > { %p112_p3 = scmp.eq.s32.totalorder %s458_s17, 1  ;;  %p459_p5 = scmp.ge.s32.totalorder %s677_s15, 1 }
   0x9   : > { %p737_p4 = por %p920_p1, %p40_p0  ;;  %p119_p7 = scmp.lt.s32.totalorder %s677_s15, 3 }
   0xa   : > { %p742_p6 = por %p112_p3, %p40_p0  ;;  %s679_s21 = smov [#allocation5]  }
   0xb   : > { %s923_s18 = scalar_select %p737_p4, 1, 0 }
   0xc   : > { %s924_s19 = scalar_select %p742_p6, 1, 0 }
   0xd   : > { %p747_p8 = pnand %p459_p5, %p119_p7  ;;  %s131_s22 = sshll.u32 %s679_s21, 4  ;;  %s751_s22 = int_to_ptr.vmem [resolvable:$true] %s131_s22 }
   0xe   : > { %s763_s24 = sadd.s32 1, %s677_s15   ;;  %s27_s25 = sadd.s32 1, %s673_s14 }
   0xf   : > { %s925_s20 = scalar_select %p747_p8, 1, 0 }
  0x10   : > { %p489_p9 = pneg %p747_p8  ;;  %s24_s26 = ssub.s32 %s677_s15, %s763_s24 }
  0x11   : > { %s549_s29 = scalar_lea.hbm %s917_s1, 1024 }
  0x12   : > { %p758_p11 = pnand %p489_p9, %p920_p1  ;;  %p550_p12 = scmp.ne.s32.totalorder %s917_s1, %s549_s29 }
  0x13   : > { %p556_p5 = scmp.lt.u32.totalorder %s549_s29, %s917_s1 }
  0x14   : > { %p551_p13 = pneg %p758_p11 }
  0x16   : > { %p552_p0 = pnand %p551_p13, %p550_p12 }
  0x18   : > { %p553_p3 = pneg %p552_p0 }
  0x1a   : > { %p558_p7 = pnand %p556_p5, %p553_p3 }
  0x1c   : > { %561 = shalt.err (!%p558_p7)
}
  0x1d   : > { %s562_s7 = scalar_lea.vmem %s751_s22, 1024  ;;  %p570_p2 = scmp.lt.s32.totalorder %s751_s22, %s751_s22 }
  0x1e   : > { %p563_p9 = scmp.ne.s32.totalorder %s751_s22, %s562_s7  ;;  %p571_p6 = scmp.lt.s32.totalorder %s562_s7, %s562_s7 }
  0x20   : > { %p565_p10 = pnand %p563_p9, %p551_p13  ;;  %p572_p4 = por %p571_p6, %p570_p2 }
  0x22   : > { %p566_p1 = pneg %p565_p10 }
  0x24   : > { %p573_p8 = pnand %p572_p4, %p566_p1 }
  0x26   : > { %576 = shalt.err (!%p573_p8)
}
  0x27   : > { %s680_s8 = smov 256   ;;  %s681_s9 = smov 16  }
  0x28   : > { %492 = dma.hbm_to_vmem [thread:$0]  (!%p758_p11), %s917_s1, 1024, %s751_s22, [#allocation6], %s680_s8, %s680_s8, %s681_s9  }
  0x29   : > { %p25_p2 = scmp.eq.s32.totalorder %s24_s26, 0  ;;  %p34_p1 = scmp.ne.s32.totalorder %s673_s14, %s669_s13 }
  0x2a   : > { %p35_p4 = scmp.eq.s32.totalorder %s677_s15, 0  ;;  %p502_p6 = scmp.lt.s32.totalorder %s677_s15, 2 }
  0x2b   : > { %s794_s17 = scalar_select %p25_p2, %s673_s14, %s27_s25  }
  0x2c   : > { %p36_p8 = por %p35_p4, %p34_p1  ;;  %p927_p10 = scmp.eq.s32.totalorder %s728_s16, 1 }
  0x2d   : > { %s148_s27 = sand.u32 1, %s673_s14   ;;  %s463_s28 = sshll.u32 %s677_s15, 7 }
  0x2e   : > { %p798_p12 = por %p927_p10, %p34_p1  ;;  %s462_s29 = sshll.u32 %s148_s27, 3 }
  0x2f   : > { %s807_s4 = scalar_lea.hbm %s916_s0, %s463_s28  ;;  %s152_s22 = scalar_lea.vmem [#allocation2], %s462_s29 }
  0x30   : > { %s159_s25 = sshll.u32 %s152_s22, 4  ;;  %p809_p11 = pnand %p502_p6, %p36_p8  ;;  %s813_s25 = int_to_ptr.vmem [resolvable:$true] %s159_s25 }
  0x31   : > { %s149_s5 = scalar_lea.sflag [#allocation3], %s148_s27  ;;  %s577_s6 = scalar_lea.hbm %s807_s4, 128 }
  0x32   : > { %p578_p13 = scmp.ne.s32.totalorder %s807_s4, %s577_s6  ;;  %p579_p0 = pneg %p809_p11 }
  0x33   : > { %s582_s9 = scalar_lea.hbm %s916_s0, 256  ;;  %p583_p7 = scmp.lt.u32.totalorder %s807_s4, %s916_s0 }
  0x34   : > { %p580_p3 = pnand %p579_p0, %p578_p13  ;;  %p584_p9 = scmp.lt.u32.totalorder %s582_s9, %s577_s6 }
  0x35   : > { %p586_p1 = scmp.lt.u32.totalorder %s577_s6, %s807_s4 }
  0x36   : > { %p581_p5 = pneg %p580_p3  ;;  %p585_p2 = por %p584_p9, %p583_p7 }
  0x38   : > { %p587_p4 = por %p586_p1, %p585_p2 }
  0x3a   : > { %p588_p6 = pnand %p587_p4, %p581_p5 }
  0x3c   : > { %591 = shalt.err (!%p588_p6)
}
  0x3d   : > { %s592_s27 = scalar_lea.vmem %s813_s25, 128  ;;  %s682_s28 = smov [#allocation2]  }
  0x3e   : > { %p593_p8 = scmp.ne.s32.totalorder %s813_s25, %s592_s27  ;;  %s597_s29 = sshll.u32 %s682_s28, 4  ;;  %s598_s29 = int_to_ptr.vmem [resolvable:$false] %s597_s29 }
  0x3f   : > { %s599_s23 = scalar_lea.vmem %s598_s29, 256  ;;  %p600_p3 = scmp.lt.s32.totalorder %s813_s25, %s598_s29 }
  0x40   : > { %p595_p10 = pnand %p593_p8, %p579_p0  ;;  %p601_p7 = scmp.lt.s32.totalorder %s599_s23, %s592_s27 }
  0x42   : > { %p596_p13 = pneg %p595_p10  ;;  %p602_p9 = por %p601_p7, %p600_p3 }
  0x44   : > { %p603_p2 = pnand %p602_p9, %p596_p13 }
  0x46   : > { %606 = shalt.err (!%p603_p2)
}
  0x47   : > { %496 = dma.hbm_to_vmem [thread:$0]  (!%p809_p11), %s807_s4, 128, %s813_s25, %s149_s5  }
  0x48   : > { %p930_p5 = scmp.ne.s32.totalorder %s925_s20, 0 }
  0x49   : > { %s843_s30 = sand.u32 (!%p930_p5), 1, %s669_s13   ;;  %p931_p0 = scmp.ne.s32.totalorder (!%p930_p5), %s923_s18, 0 }
  0x4a   : > { %168 = sbr.rel (%p930_p5) target bundleno = 496 (0x1f0), region = 32  ;;  %s465_s22 = sshll.u32 (!%p930_p5), %s843_s30, 3 }
  0x4b   : > { %s171_s6 = scalar_lea.sflag (!%p930_p5), [#allocation3], %s843_s30  ;;  %s174_s7 = scalar_lea.vmem (!%p930_p5), [#allocation2], %s465_s22 }
  0x51   : > { %652 = dma.done.wait (%p931_p0), %s171_s6, 128  }
  0x52   : > { %654 = vsyncadd (%p931_p0), %s171_s6, 4294967168  ;;  %p932_p11 = scmp.eq.s32.totalorder %s728_s16, 0 }
  0x54   : > { %656 = dma.done.wait (%p932_p11), [#allocation6], 1024   ;;  %p933_p1 = pmov %p932_p11 }
  0x55   : > { %v683_v0 = vmov 0.0   ;;  %v207_v1 = vld [vmem:[#allocation5 + $0x8] sm:$0xff]  ;;  %v209_v2 = vld [vmem:[#allocation5 + $0x18] sm:$0xff]  ;;  %v206_v3 = vld [vmem:[#allocation5] sm:$0xff]  ;;  %vm226_vm0 = vcmask 261120   ;;  %v201_v14 = vlaneseq  ;;  %s684_s4 = smov 1  }
  0x56   : > { %658 = vsyncadd (%p933_p1), [#allocation6], 4294966272  ;;  %294 = vmatprep.mubr.f32.mxu0 %v683_v0  ;;  %v473_v4 = vpack.c.bf16 %v209_v2, %v207_v1  ;;  %v208_v5 = vld [vmem:[#allocation5 + $0x10] sm:$0xff]  ;;  %v211_v6 = vld [vmem:[#allocation5 + $0x28] sm:$0xff]  ;;  %s685_s25 = smov 127   ;;  %s470_s26 = sshll.u32 %s728_s16, 7 }
  0x57   : > { %v213_v7 = vld [vmem:[#allocation5 + $0x38] sm:$0xff]  ;;  %v475_v8 = vpack.c.bf16 %v208_v5, %v206_v3  ;;  %v210_v10 = vld [vmem:[#allocation5 + $0x20] sm:$0xff]  ;;  %v212_v11 = vld [vmem:[#allocation5 + $0x30] sm:$0xff]  ;;  %v217_v15 = vshrl.u32 %v201_v14, 7  ;;  %v202_v25 = vand.u32 127, %v201_v14  ;;  %s200_s5 = scalar_lea.vmem [#allocation7], %s465_s22  ;;  %s871_s11 = scalar_lea.hbm %s919_s3, %s470_s26 }
  0x58   : > { %v477_v9 = vpack.c.bf16 %v213_v7, %v211_v6  ;;  %474 = vmatprep.subr.bf16.mxu0 %v473_v4  ;;  %v479_v12 = vpack.c.bf16 %v212_v11, %v210_v10  ;;  %v857_v13 = vld [vmem:[%s174_s7] sm:$0xff]  ;;  %s378_s8 = sshll.u32 %s200_s5, 4  ;;  %s365_s27 = scalar_lea.sflag [#allocation4], %s843_s30  ;;  %s873_s8 = int_to_ptr.vmem [resolvable:$true] %s378_s8 }
  0x59   : > { %476 = vmatpush1.bf16.msra.mxu0 %v475_v8  ;;  %v218_v16 = vsub.s32 0, %v217_v15  ;;  %v214_v17 = vld [vmem:[%s918_s2] sm:$0x3]  ;;  %v222_v18 = vsub.s32 1, %v217_v15  ;;  %vm203_vm1 = vcmp.eq.s32.totalorder %v202_v25, 0  ;;  %vm204_vm2 = vcmp.eq.s32.totalorder %v202_v25, 31 }
  0x5a   : > { %478 = vmatprep.subr.bf16.mxu0 %v477_v9  ;;  %s607_s16 = scalar_lea.vmem %s873_s8, 128  ;;  %s686_s28 = smov [#allocation7]  }
  0x5b   : > { %v219_v19 = vrot.slane %v214_v17, %v218_v16  ;;  %v223_v20 = vrot.slane %v214_v17, %v222_v18  ;;  %p608_p4 = scmp.ne.s32.totalorder %s873_s8, %s607_s16  ;;  %s611_s29 = sshll.u32 %s686_s28, 4  ;;  %s612_s29 = int_to_ptr.vmem [resolvable:$false] %s611_s29 }
  0x5c   : > { %s613_s23 = scalar_lea.vmem %s612_s29, 256  ;;  %p614_p10 = scmp.lt.s32.totalorder %s873_s8, %s612_s29 }
  0x5d   : > { %480 = vmatpush1.bf16.msra.mxu0 %v479_v12  ;;  %p609_p6 = pnand %p608_p4, %p798_p12  ;;  %p615_p13 = scmp.lt.s32.totalorder %s613_s23, %s607_s16 }
  0x5f   : > { %p610_p8 = pneg %p609_p6  ;;  %p616_p3 = por %p615_p13, %p614_p10 }
  0x60   : > { %468 = vmatmul.mubr.msk.f32.vlgmr.msra.gmra.mrb[0].mxu0 %vm226_vm0, %v857_v13 }
  0x61   : > { %p617_p7 = pnand %p616_p3, %p610_p8 }
 0x133   : > { %v296_v21 = vpop.f32.mrb[0].mxu0 }
 0x134   : > { %v297_v22 = vadd.f32 %v296_v21, %v219_v19  ;;  %v298_v23 = vpop.f32.mrb[1].mxu0 }
 0x135   : > { %v299_v24 = vadd.f32 %v298_v23, %v223_v20 }
 0x136   : > { %301 = vrot.lane.b32.xlu0 %v297_v22, %s684_s4 }
 0x137   : > { %314 = vrot.lane.b32.xlu1 %v299_v24, %s684_s4 }
 0x13a   : > { %306 = vrot.lane.b32.xlu0 %v297_v22, %s685_s25 }
 0x13b   : > { %317 = vrot.lane.b32.xlu1 %v299_v24, %s685_s25 }
 0x1a8   : > { %v302_v26 = vpop.permute.xlu0 %301 }
 0x1a9   : > { %v305_v27 = vsel %vm203_vm1, 0.0, %v302_v26  ;;  %v315_v28 = vpop.permute.xlu1 %314 }
 0x1aa   : > { %v316_v29 = vsel %vm203_vm1, -inf, %v315_v28  ;;  %v311_v30 = vadd.f32 %v305_v27, %v297_v22 }
 0x1ab   : > { %v320_v32 = vmax.f32 %v316_v29, %v299_v24 }
 0x1ac   : > { %v307_v31 = vpop.permute.xlu0 %306 }
 0x1ad   : > { %v310_v33 = vsel %vm204_vm2, 0.0, %v307_v31  ;;  %v318_v34 = vpop.permute.xlu1 %317 }
 0x1ae   : > { %v312_v35 = vadd.f32 %v311_v30, %v310_v33  ;;  %v319_v36 = vsel %vm204_vm2, -inf, %v318_v34 }
 0x1af   : > { %v321_v37 = vmax.f32 %v320_v32, %v319_v36 }
 0x1b0   : > { %v313_v38 = vmul.f32 0.33333334, %v312_v35 }
 0x1b1   : > { %v344_v39 = vmul.f32 %v321_v37, %v321_v37 }
 0x1b2   : > { %v329_v40 = vmul.f32 %v313_v38, %v313_v38  ;;  %v322_v53 = vmul.f32 %v321_v37, %v313_v38 }
 0x1b3   : > { %v345_v41 = vrot.slane %v344_v39, 4 }
 0x1b4   : > { %v330_v42 = vrot.slane %v329_v40, 4  ;;  %v323_v54 = vrot.slane %v322_v53, 4 }
 0x1b5   : > { %v346_v43 = vadd.f32 %v345_v41, %v344_v39 }
 0x1b6   : > { %v331_v44 = vadd.f32 %v330_v42, %v329_v40  ;;  %v324_v59 = vadd.f32 %v323_v54, %v322_v53 }
 0x1b7   : > { %v347_v45 = vrot.slane %v346_v43, 2 }
 0x1b8   : > { %v332_v46 = vrot.slane %v331_v44, 2  ;;  %v325_v4 = vrot.slane %v324_v59, 2 }
 0x1b9   : > { %v348_v47 = vadd.f32 %v347_v45, %v346_v43 }
 0x1ba   : > { %v333_v48 = vadd.f32 %v332_v46, %v331_v44  ;;  %v326_v6 = vadd.f32 %v325_v4, %v324_v59 }
 0x1bb   : > { %v349_v49 = vrot.slane %v348_v47, 1 }
 0x1bc   : > { %v334_v50 = vrot.slane %v333_v48, 1  ;;  %v327_v7 = vrot.slane %v326_v6, 1 }
 0x1bd   : > { %v350_v51 = vadd.f32 %v349_v49, %v348_v47 }
 0x1be   : > { %v335_v52 = vadd.f32 %v334_v50, %v333_v48  ;;  %v328_v8 = vadd.f32 %v327_v7, %v326_v6 }
 0x1bf   : > { %543 = vrsqrt.f32 %v350_v51  ;;  %vm353_vm3 = vcmp.eq.f32.partialorder %v350_v51, inf  ;;  %v356_v60 = vand.u32 2147483648, %v350_v51  ;;  %vm355_vm5 = vcmp.eq.f32.partialorder %v350_v51, 0.0 }
 0x1c0   : > { %545 = vrsqrt.f32 %v335_v52  ;;  %vm338_vm4 = vcmp.eq.f32.partialorder %v335_v52, inf  ;;  %v341_v61 = vand.u32 2147483648, %v335_v52  ;;  %vm340_vm6 = vcmp.eq.f32.partialorder %v335_v52, 0.0 }
 0x1c9   : > { %v544_v55 = vpop.eup %543 }
 0x1ca   : > { %v546_v56 = vpop.eup %545  ;;  %v352_v57 = vmul.f32 %v544_v55, %v350_v51 }
 0x1cb   : > { %v337_v58 = vmul.f32 %v546_v56, %v335_v52 }
 0x1cc   : > { %v354_v62 = vsel %vm353_vm3, %v350_v51, %v352_v57 }
 0x1cd   : > { %v339_v63 = vsel %vm338_vm4, %v335_v52, %v337_v58  ;;  %v357_v0 = vsel %vm355_vm5, %v356_v60, %v354_v62 }
 0x1ce   : > { %v342_v1 = vsel %vm340_vm6, %v341_v61, %v339_v63  ;;  %v358_v2 = vmax.f32 %v357_v0, 1e-08 }
 0x1cf   : > { %v343_v3 = vmax.f32 %v342_v1, 1e-08 }
 0x1d1   : > { %v359_v5 = vmul.f32 %v358_v2, %v343_v3 }
 0x1d3   : > { %547 = vrcp.f32 %v359_v5 }
 0x1dd   : > { %v548_v9 = vpop.eup %547 }
 0x1de   : > { %v361_v10 = vmul.f32 %v548_v9, %v328_v8 }
 0x1e0   : > { %v362_v11 = vmul.f32 %v361_v10, %v857_v13 }
 0x1e2   : > { %363 = vst.msk [vmem:[%s200_s5] sm:$0xff] %vm226_vm0, %v362_v11 }
 0x1e3   : > { %620 = shalt.err (!%p617_p7)
}
 0x1e4   : > { %s621_s30 = scalar_lea.hbm %s871_s11, 128  ;;  %s625_s7 = scalar_lea.hbm %s919_s3, 256 }
 0x1e5   : > { %p622_p9 = scmp.ne.s32.totalorder %s871_s11, %s621_s30  ;;  %p626_p0 = scmp.lt.u32.totalorder %s871_s11, %s919_s3 }
 0x1e6   : > { %p627_p11 = scmp.lt.u32.totalorder %s625_s7, %s621_s30  ;;  %p629_p4 = scmp.lt.u32.totalorder %s621_s30, %s871_s11 }
 0x1e7   : > { %p623_p2 = pnand %p622_p9, %p798_p12 }
 0x1e8   : > { %p628_p1 = por %p627_p11, %p626_p0 }
 0x1e9   : > { %p624_p5 = pneg %p623_p2 }
 0x1ea   : > { %p630_p6 = por %p629_p4, %p628_p1 }
 0x1ec   : > { %p631_p8 = pnand %p630_p6, %p624_p5 }
 0x1ee   : > { %634 = shalt.err (!%p631_p8)
}
 0x1ef   : > { %487 = dma.vmem_to_hbm [thread:$0]  (%p798_p12), %s873_s8, 128, %s871_s11, %s365_s27  }
 0x1f0 PF: > { %s390_s4 = sand.u32 1, %s665_s12   ;;  %p934_p10 = scmp.ne.s32.totalorder %s924_s19, 0 }
 0x1f1   : > { %p935_p13 = scmp.ge.s32.totalorder %s677_s15, 2  ;;  %s391_s25 = scalar_lea.sflag [#allocation4], %s390_s4 }
 0x1f3   : > { %p498_p3 = pnand %p935_p13, %p934_p10 }
 0x1f5   : > { %660 = dma.done.wait (!%p498_p3), %s391_s25, 128  }
 0x1f6   : > { %662 = vsyncadd (!%p498_p3), %s391_s25, 4294967168  ;;  %p17_p7 = scmp.ge.s32.totalorder %s763_s24, 4   ;;  %s936_s12 = smov %s669_s13 }
 0x1f7   : > { %s937_s13 = smov %s673_s14  ;;  %s938_s14 = smov %s794_s17 }
 0x1f8   : > { %s939_s15 = smov %s763_s24  ;;  %19 = sbr.rel (!%p17_p7) target bundleno = 6 (0x6), region = 81 }
 0x1ff   :  { %396 = vsyncpa [#allocation3], 1 }
 0x200   :  { %398 = vsyncpa [#allocation3 + $0x1], 1 }
 0x201   :  { %399 = vsyncpa [#allocation6], 1 }
 0x202   :  { %400 = vsyncpa [#allocation4], 1 }
 0x203   :  { %402 = vsyncpa [#allocation4 + $0x1], 1 }

// kernel: tpu_custom_call.1
= control target key start
LH: loop header
LB: loop body
LE: loop exit
PB: predicated region body
PF: predicated region fallthrough
CT: control target
= control target key end

     0   :  { %8 = vsyncpa [#allocation3], 0  ;;  %s916_s0 = inlined_call_operand.hbm [shape: f32[2,8,32], index: 0, kind: input, shape index: {}]   ;;  %s917_s1 = inlined_call_operand.hbm [shape: f32[32,256], index: 1, kind: input, shape index: {}]   ;;  %s918_s2 = inlined_call_operand.vmem [shape: f32[1,256], index: 2, kind: input, shape index: {}]   ;;  %s919_s3 = inlined_call_operand.hbm [shape: f32[2,8,32], index: 3, kind: output, shape index: {}]  }
   0x1   :  { %10 = vsyncpa [#allocation3 + $0x1], 0 }
   0x2   :  { %11 = vsyncpa [#allocation6], 0 }
   0x3   :  { %12 = vsyncpa [#allocation4], 0 }
   0x4   :  { %14 = vsyncpa [#allocation4 + $0x1], 0  ;;  %s707_s12 = smov 0   ;;  %s709_s13 = smov 0  }
   0x5   :  { %s711_s14 = smov 0   ;;  %s713_s15 = smov 0  }
   0x6 LB: > { %s728_s16 = sadd.s32 4294967295, %s677_s15   ;;  %s458_s17 = sadd.s32 4294967294, %s677_s15   ;;  %s677_s15 = sphi %s713_s15, %s939_s15   ;;  %s673_s14 = sphi %s711_s14, %s938_s14   ;;  %s669_s13 = sphi %s709_s13, %s937_s13   ;;  %s665_s12 = sphi %s707_s12, %s936_s12  }
   0x7   : > { %p40_p0 = scmp.ne.s32.totalorder %s669_s13, %s665_s12  ;;  %p920_p1 = scmp.eq.s32.totalorder %s728_s16, 0 }
   0x8   : > { %p112_p3 = scmp.eq.s32.totalorder %s458_s17, 1  ;;  %p459_p5 = scmp.ge.s32.totalorder %s677_s15, 1 }
   0x9   : > { %p737_p4 = por %p920_p1, %p40_p0  ;;  %p119_p7 = scmp.lt.s32.totalorder %s677_s15, 3 }
   0xa   : > { %p742_p6 = por %p112_p3, %p40_p0  ;;  %s679_s21 = smov [#allocation5]  }
   0xb   : > { %s923_s18 = scalar_select %p737_p4, 1, 0 }
   0xc   : > { %s924_s19 = scalar_select %p742_p6, 1, 0 }
   0xd   : > { %p747_p8 = pnand %p459_p5, %p119_p7  ;;  %s131_s22 = sshll.u32 %s679_s21, 4  ;;  %s751_s22 = int_to_ptr.vmem [resolvable:$true] %s131_s22 }
   0xe   : > { %s763_s24 = sadd.s32 1, %s677_s15   ;;  %s27_s25 = sadd.s32 1, %s673_s14 }
   0xf   : > { %s925_s20 = scalar_select %p747_p8, 1, 0 }
  0x10   : > { %p489_p9 = pneg %p747_p8  ;;  %s24_s26 = ssub.s32 %s677_s15, %s763_s24 }
  0x11   : > { %s549_s29 = scalar_lea.hbm %s917_s1, 1024 }
  0x12   : > { %p758_p11 = pnand %p489_p9, %p920_p1  ;;  %p550_p12 = scmp.ne.s32.totalorder %s917_s1, %s549_s29 }
  0x13   : > { %p556_p5 = scmp.lt.u32.totalorder %s549_s29, %s917_s1 }
  0x14   : > { %p551_p13 = pneg %p758_p11 }
  0x16   : > { %p552_p0 = pnand %p551_p13, %p550_p12 }
  0x18   : > { %p553_p3 = pneg %p552_p0 }
  0x1a   : > { %p558_p7 = pnand %p556_p5, %p553_p3 }
  0x1c   : > { %561 = shalt.err (!%p558_p7)
}
  0x1d   : > { %s562_s7 = scalar_lea.vmem %s751_s22, 1024  ;;  %p570_p2 = scmp.lt.s32.totalorder %s751_s22, %s751_s22 }
  0x1e   : > { %p563_p9 = scmp.ne.s32.totalorder %s751_s22, %s562_s7  ;;  %p571_p6 = scmp.lt.s32.totalorder %s562_s7, %s562_s7 }
  0x20   : > { %p565_p10 = pnand %p563_p9, %p551_p13  ;;  %p572_p4 = por %p571_p6, %p570_p2 }
  0x22   : > { %p566_p1 = pneg %p565_p10 }
  0x24   : > { %p573_p8 = pnand %p572_p4, %p566_p1 }
  0x26   : > { %576 = shalt.err (!%p573_p8)
}
  0x27   : > { %s680_s8 = smov 256   ;;  %s681_s9 = smov 16  }
  0x28   : > { %492 = dma.hbm_to_vmem [thread:$0]  (!%p758_p11), %s917_s1, 1024, %s751_s22, [#allocation6], %s680_s8, %s680_s8, %s681_s9  }
  0x29   : > { %p25_p2 = scmp.eq.s32.totalorder %s24_s26, 0  ;;  %p34_p1 = scmp.ne.s32.totalorder %s673_s14, %s669_s13 }
  0x2a   : > { %p35_p4 = scmp.eq.s32.totalorder %s677_s15, 0  ;;  %p502_p6 = scmp.lt.s32.totalorder %s677_s15, 2 }
  0x2b   : > { %s794_s17 = scalar_select %p25_p2, %s673_s14, %s27_s25  }
  0x2c   : > { %p36_p8 = por %p35_p4, %p34_p1  ;;  %p927_p10 = scmp.eq.s32.totalorder %s728_s16, 1 }
  0x2d   : > { %s148_s27 = sand.u32 1, %s673_s14   ;;  %s463_s28 = sshll.u32 %s677_s15, 7 }
  0x2e   : > { %p798_p12 = por %p927_p10, %p34_p1  ;;  %s462_s29 = sshll.u32 %s148_s27, 3 }
  0x2f   : > { %s807_s4 = scalar_lea.hbm %s916_s0, %s463_s28  ;;  %s152_s22 = scalar_lea.vmem [#allocation2], %s462_s29 }
  0x30   : > { %s159_s25 = sshll.u32 %s152_s22, 4  ;;  %p809_p11 = pnand %p502_p6, %p36_p8  ;;  %s813_s25 = int_to_ptr.vmem [resolvable:$true] %s159_s25 }
  0x31   : > { %s149_s5 = scalar_lea.sflag [#allocation3], %s148_s27  ;;  %s577_s6 = scalar_lea.hbm %s807_s4, 128 }
  0x32   : > { %p578_p13 = scmp.ne.s32.totalorder %s807_s4, %s577_s6  ;;  %p579_p0 = pneg %p809_p11 }
  0x33   : > { %s582_s9 = scalar_lea.hbm %s916_s0, 256  ;;  %p583_p7 = scmp.lt.u32.totalorder %s807_s4, %s916_s0 }
  0x34   : > { %p580_p3 = pnand %p579_p0, %p578_p13  ;;  %p584_p9 = scmp.lt.u32.totalorder %s582_s9, %s577_s6 }
  0x35   : > { %p586_p1 = scmp.lt.u32.totalorder %s577_s6, %s807_s4 }
  0x36   : > { %p581_p5 = pneg %p580_p3  ;;  %p585_p2 = por %p584_p9, %p583_p7 }
  0x38   : > { %p587_p4 = por %p586_p1, %p585_p2 }
  0x3a   : > { %p588_p6 = pnand %p587_p4, %p581_p5 }
  0x3c   : > { %591 = shalt.err (!%p588_p6)
}
  0x3d   : > { %s592_s27 = scalar_lea.vmem %s813_s25, 128  ;;  %s682_s28 = smov [#allocation2]  }
  0x3e   : > { %p593_p8 = scmp.ne.s32.totalorder %s813_s25, %s592_s27  ;;  %s597_s29 = sshll.u32 %s682_s28, 4  ;;  %s598_s29 = int_to_ptr.vmem [resolvable:$false] %s597_s29 }
  0x3f   : > { %s599_s23 = scalar_lea.vmem %s598_s29, 256  ;;  %p600_p3 = scmp.lt.s32.totalorder %s813_s25, %s598_s29 }
  0x40   : > { %p595_p10 = pnand %p593_p8, %p579_p0  ;;  %p601_p7 = scmp.lt.s32.totalorder %s599_s23, %s592_s27 }
  0x42   : > { %p596_p13 = pneg %p595_p10  ;;  %p602_p9 = por %p601_p7, %p600_p3 }
  0x44   : > { %p603_p2 = pnand %p602_p9, %p596_p13 }
  0x46   : > { %606 = shalt.err (!%p603_p2)
}
  0x47   : > { %496 = dma.hbm_to_vmem [thread:$0]  (!%p809_p11), %s807_s4, 128, %s813_s25, %s149_s5  }
  0x48   : > { %p930_p5 = scmp.ne.s32.totalorder %s925_s20, 0 }
  0x49   : > { %s843_s30 = sand.u32 (!%p930_p5), 1, %s669_s13   ;;  %p931_p0 = scmp.ne.s32.totalorder (!%p930_p5), %s923_s18, 0 }
  0x4a   : > { %168 = sbr.rel (%p930_p5) target bundleno = 496 (0x1f0), region = 32  ;;  %s465_s22 = sshll.u32 (!%p930_p5), %s843_s30, 3 }
  0x4b   : > { %s171_s6 = scalar_lea.sflag (!%p930_p5), [#allocation3], %s843_s30  ;;  %s174_s7 = scalar_lea.vmem (!%p930_p5), [#allocation2], %s465_s22 }
  0x51   : > { %652 = dma.done.wait (%p931_p0), %s171_s6, 128  }
  0x52   : > { %654 = vsyncadd (%p931_p0), %s171_s6, 4294967168  ;;  %p932_p11 = scmp.eq.s32.totalorder %s728_s16, 0 }
  0x54   : > { %656 = dma.done.wait (%p932_p11), [#allocation6], 1024   ;;  %p933_p1 = pmov %p932_p11 }
  0x55   : > { %v683_v0 = vmov 0.0   ;;  %v207_v1 = vld [vmem:[#allocation5 + $0x8] sm:$0xff]  ;;  %v209_v2 = vld [vmem:[#allocation5 + $0x18] sm:$0xff]  ;;  %v206_v3 = vld [vmem:[#allocation5] sm:$0xff]  ;;  %vm226_vm0 = vcmask 261120   ;;  %v201_v14 = vlaneseq  ;;  %s684_s4 = smov 1  }
  0x56   : > { %658 = vsyncadd (%p933_p1), [#allocation6], 4294966272  ;;  %294 = vmatprep.mubr.f32.mxu0 %v683_v0  ;;  %v473_v4 = vpack.c.bf16 %v209_v2, %v207_v1  ;;  %v208_v5 = vld [vmem:[#allocation5 + $0x10] sm:$0xff]  ;;  %v211_v6 = vld [vmem:[#allocation5 + $0x28] sm:$0xff]  ;;  %s685_s25 = smov 127   ;;  %s470_s26 = sshll.u32 %s728_s16, 7 }
  0x57   : > { %v213_v7 = vld [vmem:[#allocation5 + $0x38] sm:$0xff]  ;;  %v475_v8 = vpack.c.bf16 %v208_v5, %v206_v3  ;;  %v210_v10 = vld [vmem:[#allocation5 + $0x20] sm:$0xff]  ;;  %v212_v11 = vld [vmem:[#allocation5 + $0x30] sm:$0xff]  ;;  %v217_v15 = vshrl.u32 %v201_v14, 7  ;;  %v202_v25 = vand.u32 127, %v201_v14  ;;  %s200_s5 = scalar_lea.vmem [#allocation7], %s465_s22  ;;  %s871_s11 = scalar_lea.hbm %s919_s3, %s470_s26 }
  0x58   : > { %v477_v9 = vpack.c.bf16 %v213_v7, %v211_v6  ;;  %474 = vmatprep.subr.bf16.mxu0 %v473_v4  ;;  %v479_v12 = vpack.c.bf16 %v212_v11, %v210_v10  ;;  %v857_v13 = vld [vmem:[%s174_s7] sm:$0xff]  ;;  %s378_s8 = sshll.u32 %s200_s5, 4  ;;  %s365_s27 = scalar_lea.sflag [#allocation4], %s843_s30  ;;  %s873_s8 = int_to_ptr.vmem [resolvable:$true] %s378_s8 }
  0x59   : > { %476 = vmatpush1.bf16.msra.mxu0 %v475_v8  ;;  %v218_v16 = vsub.s32 0, %v217_v15  ;;  %v214_v17 = vld [vmem:[%s918_s2] sm:$0x3]  ;;  %v222_v18 = vsub.s32 1, %v217_v15  ;;  %vm203_vm1 = vcmp.eq.s32.totalorder %v202_v25, 0  ;;  %vm204_vm2 = vcmp.eq.s32.totalorder %v202_v25, 31 }
  0x5a   : > { %478 = vmatprep.subr.bf16.mxu0 %v477_v9  ;;  %s607_s16 = scalar_lea.vmem %s873_s8, 128  ;;  %s686_s28 = smov [#allocation7]  }
  0x5b   : > { %v219_v19 = vrot.slane %v214_v17, %v218_v16  ;;  %v223_v20 = vrot.slane %v214_v17, %v222_v18  ;;  %p608_p4 = scmp.ne.s32.totalorder %s873_s8, %s607_s16  ;;  %s611_s29 = sshll.u32 %s686_s28, 4  ;;  %s612_s29 = int_to_ptr.vmem [resolvable:$false] %s611_s29 }
  0x5c   : > { %s613_s23 = scalar_lea.vmem %s612_s29, 256  ;;  %p614_p10 = scmp.lt.s32.totalorder %s873_s8, %s612_s29 }
  0x5d   : > { %480 = vmatpush1.bf16.msra.mxu0 %v479_v12  ;;  %p609_p6 = pnand %p608_p4, %p798_p12  ;;  %p615_p13 = scmp.lt.s32.totalorder %s613_s23, %s607_s16 }
  0x5f   : > { %p610_p8 = pneg %p609_p6  ;;  %p616_p3 = por %p615_p13, %p614_p10 }
  0x60   : > { %468 = vmatmul.mubr.msk.f32.vlgmr.msra.gmra.mrb[0].mxu0 %vm226_vm0, %v857_v13 }
  0x61   : > { %p617_p7 = pnand %p616_p3, %p610_p8 }
 0x133   : > { %v296_v21 = vpop.f32.mrb[0].mxu0 }
 0x134   : > { %v297_v22 = vadd.f32 %v296_v21, %v219_v19  ;;  %v298_v23 = vpop.f32.mrb[1].mxu0 }
 0x135   : > { %v299_v24 = vadd.f32 %v298_v23, %v223_v20 }
 0x136   : > { %301 = vrot.lane.b32.xlu0 %v297_v22, %s684_s4 }
 0x137   : > { %314 = vrot.lane.b32.xlu1 %v299_v24, %s684_s4 }
 0x13a   : > { %306 = vrot.lane.b32.xlu0 %v297_v22, %s685_s25 }
 0x13b   : > { %317 = vrot.lane.b32.xlu1 %v299_v24, %s685_s25 }
 0x1a8   : > { %v302_v26 = vpop.permute.xlu0 %301 }
 0x1a9   : > { %v305_v27 = vsel %vm203_vm1, 0.0, %v302_v26  ;;  %v315_v28 = vpop.permute.xlu1 %314 }
 0x1aa   : > { %v316_v29 = vsel %vm203_vm1, -inf, %v315_v28  ;;  %v311_v30 = vadd.f32 %v305_v27, %v297_v22 }
 0x1ab   : > { %v320_v32 = vmax.f32 %v316_v29, %v299_v24 }
 0x1ac   : > { %v307_v31 = vpop.permute.xlu0 %306 }
 0x1ad   : > { %v310_v33 = vsel %vm204_vm2, 0.0, %v307_v31  ;;  %v318_v34 = vpop.permute.xlu1 %317 }
 0x1ae   : > { %v312_v35 = vadd.f32 %v311_v30, %v310_v33  ;;  %v319_v36 = vsel %vm204_vm2, -inf, %v318_v34 }
 0x1af   : > { %v321_v37 = vmax.f32 %v320_v32, %v319_v36 }
 0x1b0   : > { %v313_v38 = vmul.f32 0.33333334, %v312_v35 }
 0x1b1   : > { %v344_v39 = vmul.f32 %v321_v37, %v321_v37 }
 0x1b2   : > { %v329_v40 = vmul.f32 %v313_v38, %v313_v38  ;;  %v322_v53 = vmul.f32 %v321_v37, %v313_v38 }
 0x1b3   : > { %v345_v41 = vrot.slane %v344_v39, 4 }
 0x1b4   : > { %v330_v42 = vrot.slane %v329_v40, 4  ;;  %v323_v54 = vrot.slane %v322_v53, 4 }
 0x1b5   : > { %v346_v43 = vadd.f32 %v345_v41, %v344_v39 }
 0x1b6   : > { %v331_v44 = vadd.f32 %v330_v42, %v329_v40  ;;  %v324_v59 = vadd.f32 %v323_v54, %v322_v53 }
 0x1b7   : > { %v347_v45 = vrot.slane %v346_v43, 2 }
 0x1b8   : > { %v332_v46 = vrot.slane %v331_v44, 2  ;;  %v325_v4 = vrot.slane %v324_v59, 2 }
 0x1b9   : > { %v348_v47 = vadd.f32 %v347_v45, %v346_v43 }
 0x1ba   : > { %v333_v48 = vadd.f32 %v332_v46, %v331_v44  ;;  %v326_v6 = vadd.f32 %v325_v4, %v324_v59 }
 0x1bb   : > { %v349_v49 = vrot.slane %v348_v47, 1 }
 0x1bc   : > { %v334_v50 = vrot.slane %v333_v48, 1  ;;  %v327_v7 = vrot.slane %v326_v6, 1 }
 0x1bd   : > { %v350_v51 = vadd.f32 %v349_v49, %v348_v47 }
 0x1be   : > { %v335_v52 = vadd.f32 %v334_v50, %v333_v48  ;;  %v328_v8 = vadd.f32 %v327_v7, %v326_v6 }
 0x1bf   : > { %543 = vrsqrt.f32 %v350_v51  ;;  %vm353_vm3 = vcmp.eq.f32.partialorder %v350_v51, inf  ;;  %v356_v60 = vand.u32 2147483648, %v350_v51  ;;  %vm355_vm5 = vcmp.eq.f32.partialorder %v350_v51, 0.0 }
 0x1c0   : > { %545 = vrsqrt.f32 %v335_v52  ;;  %vm338_vm4 = vcmp.eq.f32.partialorder %v335_v52, inf  ;;  %v341_v61 = vand.u32 2147483648, %v335_v52  ;;  %vm340_vm6 = vcmp.eq.f32.partialorder %v335_v52, 0.0 }
 0x1c9   : > { %v544_v55 = vpop.eup %543 }
 0x1ca   : > { %v546_v56 = vpop.eup %545  ;;  %v352_v57 = vmul.f32 %v544_v55, %v350_v51 }
 0x1cb   : > { %v337_v58 = vmul.f32 %v546_v56, %v335_v52 }
 0x1cc   : > { %v354_v62 = vsel %vm353_vm3, %v350_v51, %v352_v57 }
 0x1cd   : > { %v339_v63 = vsel %vm338_vm4, %v335_v52, %v337_v58  ;;  %v357_v0 = vsel %vm355_vm5, %v356_v60, %v354_v62 }
 0x1ce   : > { %v342_v1 = vsel %vm340_vm6, %v341_v61, %v339_v63  ;;  %v358_v2 = vmax.f32 %v357_v0, 1e-08 }
 0x1cf   : > { %v343_v3 = vmax.f32 %v342_v1, 1e-08 }
 0x1d1   : > { %v359_v5 = vmul.f32 %v358_v2, %v343_v3 }
 0x1d3   : > { %547 = vrcp.f32 %v359_v5 }
 0x1dd   : > { %v548_v9 = vpop.eup %547 }
 0x1de   : > { %v361_v10 = vmul.f32 %v548_v9, %v328_v8 }
 0x1e0   : > { %v362_v11 = vmul.f32 %v361_v10, %v857_v13 }
 0x1e2   : > { %363 = vst.msk [vmem:[%s200_s5] sm:$0xff] %vm226_vm0, %v362_v11 }
 0x1e3   : > { %620 = shalt.err (!%p617_p7)
}
 0x1e4   : > { %s621_s30 = scalar_lea.hbm %s871_s11, 128  ;;  %s625_s7 = scalar_lea.hbm %s919_s3, 256 }
 0x1e5   : > { %p622_p9 = scmp.ne.s32.totalorder %s871_s11, %s621_s30  ;;  %p626_p0 = scmp.lt.u32.totalorder %s871_s11, %s919_s3 }
 0x1e6   : > { %p627_p11 = scmp.lt.u32.totalorder %s625_s7, %s621_s30  ;;  %p629_p4 = scmp.lt.u32.totalorder %s621_s30, %s871_s11 }
 0x1e7   : > { %p623_p2 = pnand %p622_p9, %p798_p12 }
 0x1e8   : > { %p628_p1 = por %p627_p11, %p626_p0 }
 0x1e9   : > { %p624_p5 = pneg %p623_p2 }
 0x1ea   : > { %p630_p6 = por %p629_p4, %p628_p1 }
 0x1ec   : > { %p631_p8 = pnand %p630_p6, %p624_p5 }
 0x1ee   : > { %634 = shalt.err (!%p631_p8)
}
 0x1ef   : > { %487 = dma.vmem_to_hbm [thread:$0]  (%p798_p12), %s873_s8, 128, %s871_s11, %s365_s27  }
 0x1f0 PF: > { %s390_s4 = sand.u32 1, %s665_s12   ;;  %p934_p10 = scmp.ne.s32.totalorder %s924_s19, 0 }
 0x1f1   : > { %p935_p13 = scmp.ge.s32.totalorder %s677_s15, 2  ;;  %s391_s25 = scalar_lea.sflag [#allocation4], %s390_s4 }
 0x1f3   : > { %p498_p3 = pnand %p935_p13, %p934_p10 }
 0x1f5   : > { %660 = dma.done.wait (!%p498_p3), %s391_s25, 128  }
 0x1f6   : > { %662 = vsyncadd (!%p498_p3), %s391_s25, 4294967168  ;;  %p17_p7 = scmp.ge.s32.totalorder %s763_s24, 4   ;;  %s936_s12 = smov %s669_s13 }
 0x1f7   : > { %s937_s13 = smov %s673_s14  ;;  %s938_s14 = smov %s794_s17 }
 0x1f8   : > { %s939_s15 = smov %s763_s24  ;;  %19 = sbr.rel (!%p17_p7) target bundleno = 6 (0x6), region = 81 }
 0x1ff   :  { %396 = vsyncpa [#allocation3], 1 }
 0x200   :  { %398 = vsyncpa [#allocation3 + $0x1], 1 }
 0x201   :  { %399 = vsyncpa [#allocation6], 1 }
 0x202   :  { %400 = vsyncpa [#allocation4], 1 }
 0x203   :  { %402 = vsyncpa [#allocation4 + $0x1], 1 }

</bundles_post_ra>
